<compile_context>
chip_gen: v5e
topology: v5e:2x2
jax: 0.10.0
libtpu: 0.0.40
codegen_flags: <defaults>
</compile_context>

<pallas_src>
import jax
import jax.numpy as jnp
from jax.experimental import pallas as pl
from jax.experimental.pallas import tpu as pltpu


def _sqrt_kernel(x_ref, o_ref):
    # clamp negatives to zero (single VPU max), then sqrt (EUP slot)
    o_ref[...] = jnp.sqrt(jnp.maximum(x_ref[...], 0))


def _round_up(v, m):
    return ((v + m - 1) // m) * m


def _hw_tile_params():
    """Pick (tile_bytes, vmem_limit_bytes) for the local TPU generation."""
    try:
        kind = jax.devices()[0].device_kind.lower()
    except Exception:  # pragma: no cover - defensive; fall back to conservative
        kind = ""
    if "v7" in kind:
        # 3.2 TB/s HBM: a 2 MiB tile is only ~1.2 us of traffic, so the fixed
        # ~0.35 us/step overhead bites.  Use ~6 MiB tiles; resident footprint
        # (in+out, double-buffered) ~24 MiB, so raise scoped VMEM to 48 MiB
        # (64 MiB physical per TensorCore).
        return 6 * 1024 * 1024, 48 << 20
    if "v6" in kind:
        # 4 MiB tiles -> ~16 MiB resident, under the 32 MiB scoped default.
        return 4 * 1024 * 1024, None
    # v5e / unknown: 2 MiB tiles keep the ~8 MiB resident footprint safely
    # under v5e's 16 MiB scoped-VMEM default and are already ~85% of roofline.
    return 2 * 1024 * 1024, None


def _sqrt_pallas_2d(x2d, tile_bytes, vmem_limit):
    """Run the elementwise kernel over a (rows, 128) array."""
    rows, width = x2d.shape
    itemsize = jnp.dtype(x2d.dtype).itemsize

    # Largest row-block (multiple of 32 sublanes, covers f32/bf16/int8 packing)
    # that fits the per-generation tile budget.
    rows_cap = max(32, (tile_bytes // (width * itemsize)) // 32 * 32)
    # Also aim for >= ~8 grid steps so "parallel" can feed both v7x TensorCores
    # on mid-sized arrays (no effect on single-TC v5e/v6e beyond slightly
    # smaller tiles, which stay >= 32 rows).
    rows_for_megacore = max(32, _round_up(pl.cdiv(rows, 8), 32))
    block_rows = min(rows_cap, rows_for_megacore, rows)
    grid = (pl.cdiv(rows, block_rows),)

    cost = pl.CostEstimate(
        flops=rows * width,              # one max per element
        transcendentals=rows * width,    # one sqrt per element
        bytes_accessed=2 * rows * width * itemsize,
    )

    cp_kwargs = dict(dimension_semantics=("parallel",))
    if vmem_limit is not None:
        cp_kwargs["vmem_limit_bytes"] = vmem_limit

    return pl.pallas_call(
        _sqrt_kernel,
        out_shape=jax.ShapeDtypeStruct((rows, width), x2d.dtype),
        grid_spec=pltpu.PrefetchScalarGridSpec(
            num_scalar_prefetch=0,
            grid=grid,
            in_specs=[pl.BlockSpec((block_rows, width), lambda i: (i, 0))],
            out_specs=pl.BlockSpec((block_rows, width), lambda i: (i, 0)),
        ),
        compiler_params=pltpu.CompilerParams(**cp_kwargs),
        cost_estimate=cost,
    )(x2d)


def deephi_sqrt_forward(x):
    """Pallas implementation of deephi_sqrt.forward (float / no-quant path)."""
    orig_shape = x.shape
    orig_dtype = x.dtype

    flat = x.reshape(-1)
    n = flat.shape[0]
    if n == 0:
        return x

    tile_bytes, vmem_limit = _hw_tile_params()

    lane = 128
    rem = n % lane
    n_aligned = n - rem

    if n_aligned == 0:
        # Entire tensor is smaller than one lane row; plain jnp is optimal.
        out_flat = jnp.sqrt(jnp.maximum(flat, 0))
        return out_flat.reshape(orig_shape).astype(orig_dtype)

    if rem == 0:
        # Common NCHW case: free reshape, no pad/slice copies at all.
        head = flat.reshape(-1, lane)
        out2d = _sqrt_pallas_2d(head, tile_bytes, vmem_limit)
        return out2d.reshape(orig_shape)

    # Unaligned size: Pallas handles the 128-aligned prefix, plain jnp handles
    # the <128-element tail; stitch with a single concatenate (no padded-buffer
    # allocation, no sqrt on padding).
    head = flat[:n_aligned].reshape(-1, lane)
    head_out = _sqrt_pallas_2d(head, tile_bytes, vmem_limit).reshape(-1)
    tail_out = jnp.sqrt(jnp.maximum(flat[n_aligned:], 0)).astype(orig_dtype)
    out_flat = jnp.concatenate([head_out, tail_out])
    return out_flat.reshape(orig_shape)


if __name__ == "__main__":
    key = jax.random.PRNGKey(0)

    # NCHW input, small shape; includes negative values to exercise the clamp.
    x = jax.random.normal(key, (2, 4, 16, 16), dtype=jnp.float32)
    out = jax.block_until_ready(deephi_sqrt_forward(x))
    ref = jnp.sqrt(jnp.where(x < 0, 0.0, x))
    assert out.shape == x.shape and out.dtype == x.dtype
    assert jnp.allclose(out, ref, atol=1e-6, rtol=1e-6)

    # Also exercise the non-128-aligned path (prefix kernel + jnp tail).
    x2 = jax.random.normal(jax.random.PRNGKey(1), (130,), dtype=jnp.float32)
    out2 = jax.block_until_ready(deephi_sqrt_forward(x2))
    ref2 = jnp.sqrt(jnp.where(x2 < 0, 0.0, x2))
    assert jnp.allclose(out2, ref2, atol=1e-6, rtol=1e-6)

    print("KERNEL_OK")
</pallas_src>

<mosaic_0001>
module attributes {stable_mosaic.version = 11 : i64} {
  func.func @_sqrt_kernel(%arg0: i32, %arg1: memref<16x128xf32, #tpu.memory_space<vmem>>, %arg2: memref<16x128xf32, #tpu.memory_space<vmem>>) attributes {dimension_semantics = [#tpu.dimension_semantics<parallel>], iteration_bounds = array<i64: 1>, scalar_prefetch = 0 : i64, scratch_operands = 0 : i64, tpu.core_type = #tpu.core_type<tc>, window_params = [{transform_indices = @transform_0, window_bounds = array<i64: 16, 128>}, {transform_indices = @transform_1, window_bounds = array<i64: 16, 128>}]} {
    %c0 = arith.constant 0 : index
    %c0_0 = arith.constant 0 : index
    %0 = vector.load %arg1[%c0, %c0_0] : memref<16x128xf32, #tpu.memory_space<vmem>>, vector<16x128xf32>
    %cst = arith.constant 0.000000e+00 : f32
    %1 = vector.broadcast %cst : f32 to vector<16x128xf32>
    %2 = arith.maximumf %0, %1 : vector<16x128xf32>
    %3 = math.sqrt %2 : vector<16x128xf32>
    %c0_1 = arith.constant 0 : index
    %c0_2 = arith.constant 0 : index
    %4 = vector.load %arg2[%c0_1, %c0_2] : memref<16x128xf32, #tpu.memory_space<vmem>>, vector<16x128xf32>
    tpu.vector_store %arg2[%c0_1, %c0_2], %3 {strides = array<i32>} : memref<16x128xf32, #tpu.memory_space<vmem>>, vector<16x128xf32>,
    return
  }
  func.func @transform_0(%arg0: i32) -> (i32, i32) {
    %c0_i32 = arith.constant 0 : i32
    %c0_i32_0 = arith.constant 0 : i32
    return %arg0, %c0_i32 : i32, i32
  }
  func.func @transform_1(%arg0: i32) -> (i32, i32) {
    %c0_i32 = arith.constant 0 : i32
    %c0_i32_0 = arith.constant 0 : i32
    return %arg0, %c0_i32 : i32, i32
  }
}

</mosaic_0001>

<bundles_post_ra>
// kernel: tpu_custom_call.1
= control target key start
LH: loop header
LB: loop body
LE: loop exit
PB: predicated region body
PF: predicated region fallthrough
CT: control target
= control target key end

     0   :  { %6 = vsyncpa [#allocation3], 0  ;;  %s160_s0 = inlined_call_operand.hbm [shape: f32[16,128], index: 0, kind: input, shape index: {}]   ;;  %s161_s1 = inlined_call_operand.hbm [shape: f32[16,128], index: 1, kind: output, shape index: {}]  }
   0x1   :  { %7 = vsyncpa [#allocation4], 0  ;;  %s12_s8 = sshll.u32 %s160_s0, 4  ;;  %s134_s9 = smov [#allocation2]   ;;  %s13_s8 = int_to_ptr.hbm [resolvable:$true] %s12_s8 }
   0x2   :  { %s14_s10 = sshll.u32 %s134_s9, 4  ;;  %s135_s11 = smov 128   ;;  %s15_s10 = int_to_ptr.vmem [resolvable:$true] %s14_s10 }
   0x3   :  { %s136_s12 = smov 8  }
   0x4   :  { %20 = dma.hbm_to_vmem [thread:$0]  %s13_s8, 256, %s15_s10, [#allocation3], %s135_s11, %s135_s11, %s136_s12  }
   0x5   :  { %130 = dma.done.wait [#allocation3], 256  }
   0x6   :  { %131 = vsyncadd [#allocation3], 4294967040  ;;  %v25_v0 = vld [vmem:[#allocation2] sm:$0xff]  ;;  %v26_v1 = vld [vmem:[#allocation2 + $0x8] sm:$0xff]  ;;  %s137_s0 = smov [#allocation5]   ;;  %s61_s16 = sshll.u32 %s161_s1, 4  ;;  %s62_s16 = int_to_ptr.hbm [resolvable:$true] %s61_s16 }
   0x7   :  { %v27_v2 = vmax.f32 %v25_v0, 0.0  ;;  %v28_v3 = vmax.f32 %v26_v1, 0.0  ;;  %s59_s13 = sshll.u32 %s137_s0, 4  ;;  %s60_s13 = int_to_ptr.vmem [resolvable:$true] %s59_s13 }
   0x9   :  { %78 = vrsqrt.f32 %v27_v2  ;;  %vm36_vm0 = vcmp.eq.f32.partialorder %v27_v2, inf  ;;  %v39_v15 = vand.u32 2147483648, %v27_v2  ;;  %vm38_vm1 = vcmp.eq.f32.partialorder %v27_v2, 0.0 }
   0xa   :  { %80 = vrsqrt.f32 %v28_v3  ;;  %vm48_vm2 = vcmp.eq.f32.partialorder %v28_v3, inf  ;;  %v51_v18 = vand.u32 2147483648, %v28_v3  ;;  %vm50_vm3 = vcmp.eq.f32.partialorder %v28_v3, 0.0 }
   0xf   :  { %v79_v4 = vpop.eup %78 }
  0x10   :  { %v81_v5 = vpop.eup %80  ;;  %v30_v6 = vmul.f32 %v79_v4, %v27_v2 }
  0x11   :  { %v42_v7 = vmul.f32 %v81_v5, %v28_v3 }
  0x12   :  { %v31_v8 = vmul.f32 %v79_v4, %v30_v6 }
  0x13   :  { %v43_v9 = vmul.f32 %v81_v5, %v42_v7 }
  0x14   :  { %v32_v10 = vmul.f32 0.5, %v31_v8 }
  0x15   :  { %v44_v11 = vmul.f32 0.5, %v43_v9 }
  0x16   :  { %v33_v12 = vsub.f32 1.5, %v32_v10 }
  0x17   :  { %v45_v13 = vsub.f32 1.5, %v44_v11 }
  0x18   :  { %v34_v14 = vmul.f32 %v79_v4, %v33_v12 }
  0x19   :  { %v46_v16 = vmul.f32 %v81_v5, %v45_v13 }
  0x1a   :  { %v35_v17 = vmul.f32 %v34_v14, %v27_v2 }
  0x1b   :  { %v47_v19 = vmul.f32 %v46_v16, %v28_v3 }
  0x1c   :  { %v37_v20 = vsel %vm36_vm0, %v27_v2, %v35_v17 }
  0x1d   :  { %v40_v21 = vsel %vm38_vm1, %v39_v15, %v37_v20  ;;  %v49_v22 = vsel %vm48_vm2, %v28_v3, %v47_v19 }
  0x1e   :  { %53 = vst [vmem:[#allocation5] sm:$0xff] %v40_v21  ;;  %v52_v23 = vsel %vm50_vm3, %v51_v18, %v49_v22 }
  0x1f   :  { %54 = vst [vmem:[#allocation5 + $0x8] sm:$0xff] %v52_v23 }
  0x20   :  { %67 = dma.vmem_to_hbm [thread:$0]  %s60_s13, 256, %s62_s16, [#allocation4], %s135_s11, %s135_s11, %s136_s12  }
  0x21   :  { %132 = dma.done.wait [#allocation4], 256  }
  0x22   :  { %133 = vsyncadd [#allocation4], 4294967040 }
  0x23   :  { %72 = vsyncpa [#allocation3], 1 }
  0x24   :  { %73 = vsyncpa [#allocation4], 1 }

</bundles_post_ra>
